<compile_context>
chip_gen: v7x
topology: tpu7x:2x2x1
jax: 0.10.0
libtpu: 0.0.40
codegen_flags: <defaults>
</compile_context>

<pallas_src>
import functools

import jax
import jax.numpy as jnp
import numpy as np
from jax.experimental import pallas as pl
from jax.experimental.pallas import tpu as pltpu

EPS = 1e-5
CPAD = 128   # lane-dense padding for cin(4) / mid(16) / out_ch(64) / classes(8)


# ----------------------------- Pallas kernel -----------------------------
def shufflenet_block_kernel(seq_len, seq_per_tile, cpad,
                            x_ref, wa_ref, wbf_ref, wsf_ref, c_ref, out_ref):
    S, L = seq_per_tile, seq_len

    x = x_ref[...]                                           # (S*L, cpad) bf16
    c = c_ref[...]                                           # (5, cpad) f32
    # c rows: [ba | w0+w1+w2 | w0(prev tap) | w2(next tap) | folded out bias]

    # gconv1 + bn1 + ReLU -- the only nonlinearity, hence the only full-width
    # stage (rows x 128).  bf16 operands, f32 accumulation.
    h = jnp.maximum(
        jnp.dot(x, wa_ref[...], preferred_element_type=jnp.float32) + c[0:1],
        0.0)                                                 # (S*L, cpad) f32

    # Pool-commute: per-sequence sums (tiles always hold whole sequences).
    h3 = h.reshape(S, L, cpad)
    hsum = jnp.sum(h3, axis=1)                               # (S, cpad)

    # Depthwise k=3 pad=1 (+bn2, ChannelShuffle folded) pooled analytically:
    #   sum_t d_t = (w0+w1+w2)*sum_t h_t - w0*h_{L-1} - w2*h_0   (bd folded out)
    dsum = c[1:2] * hsum - c[2:3] * h3[:, L - 1, :] - c[3:4] * h3[:, 0, :]

    # Shortcut branch pooled: per-sequence sum of x.
    xsum = jnp.sum(x.reshape(S, L, cpad).astype(jnp.float32), axis=1)

    # gconv2+bn3, residual add, 1/L pool scale and fc are all folded into
    # wbf = (wb@wf)/L, wsf = (w_sc@wf)/L and the bias row c[4].
    out_ref[...] = (
        jnp.dot(dsum.astype(jnp.bfloat16), wbf_ref[...],
                preferred_element_type=jnp.float32)
        + jnp.dot(xsum.astype(jnp.bfloat16), wsf_ref[...],
                  preferred_element_type=jnp.float32)
        + c[4:5])                                            # (S, cpad) f32


# ----------------------------- parameter setup ----------------------------
def init_raw_params(key, cin, num_classes, groups):
    out_ch = 64
    mid = out_ch // 4
    ks = jax.random.split(key, 32)
    it = iter(ks)

    def rnd(shape, scale=0.2):
        return (scale * jax.random.normal(next(it), shape)).astype(jnp.float32)

    def bn(c):
        return dict(
            gamma=(1.0 + 0.1 * jax.random.normal(next(it), (c,))).astype(jnp.float32),
            beta=rnd((c,)),
            mean=rnd((c,)),
            var=(1.0 + 0.1 * jnp.abs(jax.random.normal(next(it), (c,)))).astype(jnp.float32),
        )

    return dict(
        groups=groups, cin=cin, mid=mid, out_ch=out_ch,
        w_g1=rnd((mid, cin // groups, 1)), b_g1=rnd((mid,)), bn1=bn(mid),
        w_dw=rnd((mid, 1, 3)), b_dw=rnd((mid,)), bn2=bn(mid),
        w_g2=rnd((out_ch, mid // groups, 1)), b_g2=rnd((out_ch,)), bn3=bn(out_ch),
        w_sc=rnd((out_ch, cin, 1)), b_sc=rnd((out_ch,)), bn_sc=bn(out_ch),
        w_fc=rnd((num_classes, out_ch)), b_fc=rnd((num_classes,)),
    )


def fold_bn_into(w_cols, b, bnp):
    # w_cols: (..., C) with last axis = output channel; b: (C,)
    scale = bnp['gamma'] / jnp.sqrt(bnp['var'] + EPS)
    return w_cols * scale, (b - bnp['mean']) * scale + bnp['beta']


def grouped_to_dense(w, groups):
    # torch weight (C_out, C_in//g, 1) -> dense matmul weight (C_in, C_out)
    c_out, cpg, _ = w.shape
    c_in = cpg * groups
    cog = c_out // groups
    dense = jnp.zeros((c_in, c_out), dtype=w.dtype)
    for g in range(groups):
        blk = w[g * cog:(g + 1) * cog, :, 0]                  # (cog, cpg)
        dense = dense.at[g * cpg:(g + 1) * cpg, g * cog:(g + 1) * cog].set(blk.T)
    return dense


def shuffle_src_indices(mid, groups):
    # ChannelShuffle: shuffled channel c reads original channel src[c]
    cpg = mid // groups
    return [(c % groups) * cpg + c // groups for c in range(mid)]


def pad2(a, r, c):
    out = jnp.zeros((r, c), a.dtype)
    return out.at[:a.shape[0], :a.shape[1]].set(a)


def build_kernel_params(raw, seq_len, cpad=CPAD):
    groups, mid, out_ch, cin = raw['groups'], raw['mid'], raw['out_ch'], raw['cin']
    nc = raw['w_fc'].shape[0]

    src = shuffle_src_indices(mid, groups)
    dst = [0] * mid
    for c_new, c_old in enumerate(src):
        dst[c_old] = c_new
    dst = jnp.array(dst)

    # gconv1 + bn1
    wa = grouped_to_dense(raw['w_g1'], groups)                # (cin, mid)
    wa, ba = fold_bn_into(wa, raw['b_g1'], raw['bn1'])

    # depthwise k=3 + bn2; ChannelShuffle folded as a static channel perm
    wd = raw['w_dw'][dst, 0, :].T                             # (3, mid) taps prev/ctr/next
    bn2p = {k: raw['bn2'][k][dst] for k in raw['bn2']}
    wd, bd = fold_bn_into(wd, raw['b_dw'][dst], bn2p)

    # gconv2 + bn3 (input rows permuted), shortcut 1x1 conv + bn, fc
    wb = grouped_to_dense(raw['w_g2'], groups)[dst, :]        # (mid, out_ch)
    wb, bb = fold_bn_into(wb, raw['b_g2'], raw['bn3'])
    ws = raw['w_sc'][:, :, 0].T                               # (cin, out_ch)
    ws, bs = fold_bn_into(ws, raw['b_sc'], raw['bn_sc'])
    wf = raw['w_fc'].T                                        # (out_ch, nc)
    bf = raw['b_fc']

    # Pool-commute folding (valid because only the fc logits are emitted):
    #   out = dsum @ (wb@wf)/L + xsum @ (ws@wf)/L + ((bd@wb + bb + bs)@wf + bf)
    wbf = (wb @ wf) / seq_len                                 # (mid, nc)
    wsf = (ws @ wf) / seq_len                                 # (cin, nc)
    bfold = (bd @ wb + bb + bs) @ wf + bf                     # (nc,)

    consts = jnp.stack([
        jnp.pad(ba, (0, cpad - mid)),
        jnp.pad(wd[0] + wd[1] + wd[2], (0, cpad - mid)),
        jnp.pad(wd[0], (0, cpad - mid)),                      # prev tap
        jnp.pad(wd[2], (0, cpad - mid)),                      # next tap
        jnp.pad(bfold, (0, cpad - nc)),
    ]).astype(jnp.float32)                                    # (5, cpad)

    return dict(
        num_classes=nc,
        wa=pad2(wa, cpad, cpad).astype(jnp.bfloat16),         # (cpad, cpad)
        wbf=pad2(wbf, cpad, cpad).astype(jnp.bfloat16),       # (cpad, cpad)
        wsf=pad2(wsf, cpad, cpad).astype(jnp.bfloat16),       # (cpad, cpad)
        consts=consts,
    )


# ------------------------------ wrapper -----------------------------------
def choose_seq_per_tile(n, l, max_rows):
    # Tiles hold whole sequences.  With >1 tile the block dims must respect
    # the (8,128) rule and bf16's 16-row sublane packing.
    legal = []
    for s in range(n, 0, -1):
        if n % s:
            continue
        if s == n:
            legal.append(s)                      # single tile == full array
        elif s % 8 == 0 and (s * l) % 16 == 0:
            legal.append(s)
    fitting = [s for s in legal if s * l <= max_rows]
    cand = fitting if fitting else legal         # never split a sequence
    # Prefer an even tile count >= 2 so the "parallel" axis shards across both
    # v7x TensorCores; otherwise take the fattest legal tile (v5e/v6e: fewer,
    # fatter steps).
    for s in cand:
        if (n // s) >= 2 and (n // s) % 2 == 0:
            return s
    return cand[0]


def shufflenet1d_forward(x_ncl, kp, *, max_rows_per_tile=2048):
    n, cin, l = x_ncl.shape
    nc = kp['num_classes']

    # channels-last slab, lane-padded to 128 -> one dense HBM->VMEM DMA per
    # tile and no narrow-lane relayout feeding the MXU.  bf16 operands.
    x2d = jnp.transpose(x_ncl, (0, 2, 1)).reshape(n * l, cin)
    x2d = jnp.pad(x2d, ((0, 0), (0, CPAD - cin))).astype(jnp.bfloat16)

    seq_per_tile = choose_seq_per_tile(n, l, max_rows_per_tile)
    assert n % seq_per_tile == 0                  # tiles = whole sequences
    num_tiles = n // seq_per_tile
    tile_r = seq_per_tile * l

    kernel = functools.partial(shufflenet_block_kernel, l, seq_per_tile, CPAD)

    def resident(shape):
        # constant index_map -> weights stay in VMEM across all grid steps
        # (pipeline_mode=pl.Buffered(1) would save ~100KB more; not needed here)
        return pl.BlockSpec(shape, lambda i: (0, 0))

    out_padded = pl.pallas_call(
        kernel,
        out_shape=jax.ShapeDtypeStruct((n, CPAD), jnp.float32),
        grid=(num_tiles,),
        in_specs=[
            pl.BlockSpec((tile_r, CPAD), lambda i: (i, 0)),   # activation tile
            resident(kp['wa'].shape),
            resident(kp['wbf'].shape),
            resident(kp['wsf'].shape),
            resident(kp['consts'].shape),
        ],
        out_specs=pl.BlockSpec((seq_per_tile, CPAD), lambda i: (i, 0)),
        compiler_params=pltpu.CompilerParams(
            dimension_semantics=("parallel",)),               # megacore on v7x
    )(x2d, kp['wa'], kp['wbf'], kp['wsf'], kp['consts'])

    return out_padded[:, :nc]                                 # drop lane padding


# -------------------------- pure-JAX reference ----------------------------
def reference_forward(x_ncl, raw):
    g = raw['groups']

    def bn(x, p):
        return ((x - p['mean'][None, :, None])
                / jnp.sqrt(p['var'][None, :, None] + EPS)
                * p['gamma'][None, :, None] + p['beta'][None, :, None])

    def conv(x, w, b, groups, pad):
        y = jax.lax.conv_general_dilated(
            x, w, window_strides=(1,), padding=[(pad, pad)],
            feature_group_count=groups,
            dimension_numbers=('NCH', 'OIH', 'NCH'))
        return y + b[None, :, None]

    residual = bn(conv(x_ncl, raw['w_sc'], raw['b_sc'], 1, 0), raw['bn_sc'])
    h = jax.nn.relu(bn(conv(x_ncl, raw['w_g1'], raw['b_g1'], g, 0), raw['bn1']))
    # ChannelShuffle (the spec module): view -> permute -> view
    n, c, l = h.shape
    h = h.reshape(n, g, c // g, l).transpose(0, 2, 1, 3).reshape(n, c, l)
    h = bn(conv(h, raw['w_dw'], raw['b_dw'], c, 1), raw['bn2'])
    h = bn(conv(h, raw['w_g2'], raw['b_g2'], g, 0), raw['bn3'])
    h = h + residual
    p = jnp.mean(h, axis=2)
    return p @ raw['w_fc'].T + raw['b_fc'][None, :]


# -------------------------------- main -------------------------------------
if __name__ == "__main__":
    N, CIN, L, NUM_CLASSES, GROUPS = 16, 4, 16, 8, 2

    key = jax.random.PRNGKey(0)
    kx, kparam = jax.random.split(key)
    x = jax.random.normal(kx, (N, CIN, L), dtype=jnp.float32)

    raw = init_raw_params(kparam, CIN, NUM_CLASSES, GROUPS)
    kern_params = build_kernel_params(raw, L)

    # sanity: the folded permutation equals the PyTorch ChannelShuffle forward
    mid, g = raw['mid'], raw['groups']
    src = np.array(shuffle_src_indices(mid, g))
    t = np.arange(2 * mid * 5, dtype=np.float32).reshape(2, mid, 5)
    shuffled = t.reshape(2, g, mid // g, 5).transpose(0, 2, 1, 3).reshape(2, mid, 5)
    np.testing.assert_array_equal(shuffled, t[:, src, :])

    # default tiling: 2 even tiles of 8 sequences (128 rows) -> both v7x TCs,
    # near single-step on v5e/v6e
    out = shufflenet1d_forward(x, kern_params)
    out = jax.block_until_ready(out)

    ref = reference_forward(x, raw)
    assert out.shape == (N, NUM_CLASSES)
    # bf16 matmul operands vs. f32 reference -> loosened tolerance
    np.testing.assert_allclose(np.asarray(out), np.asarray(ref),
                               rtol=3e-2, atol=3e-2)
    print("KERNEL_OK")
</pallas_src>

<mosaic_0001>
module attributes {stable_mosaic.version = 11 : i64} {
  func.func @shufflenet_block_kernel(%arg0: i32, %arg1: memref<128x128xbf16, #tpu.memory_space<vmem>>, %arg2: memref<128x128xbf16, #tpu.memory_space<vmem>>, %arg3: memref<128x128xbf16, #tpu.memory_space<vmem>>, %arg4: memref<128x128xbf16, #tpu.memory_space<vmem>>, %arg5: memref<5x128xf32, #tpu.memory_space<vmem>>, %arg6: memref<8x128xf32, #tpu.memory_space<vmem>>) attributes {dimension_semantics = [#tpu.dimension_semantics<parallel>], iteration_bounds = array<i64: 2>, scalar_prefetch = 0 : i64, scratch_operands = 0 : i64, tpu.core_type = #tpu.core_type<tc>, window_params = [{transform_indices = @transform_0, window_bounds = array<i64: 128, 128>}, {pipeline_mode = #tpu.pipeline_mode<synchronous>, transform_indices = @transform_1, window_bounds = array<i64: 128, 128>}, {pipeline_mode = #tpu.pipeline_mode<synchronous>, transform_indices = @transform_2, window_bounds = array<i64: 128, 128>}, {pipeline_mode = #tpu.pipeline_mode<synchronous>, transform_indices = @transform_3, window_bounds = array<i64: 128, 128>}, {pipeline_mode = #tpu.pipeline_mode<synchronous>, transform_indices = @transform_4, window_bounds = array<i64: 5, 128>}, {transform_indices = @transform_5, window_bounds = array<i64: 8, 128>}]} {
    %c0 = arith.constant 0 : index
    %c0_0 = arith.constant 0 : index
    %0 = vector.load %arg1[%c0, %c0_0] : memref<128x128xbf16, #tpu.memory_space<vmem>>, vector<128x128xbf16>
    %c0_1 = arith.constant 0 : index
    %c0_2 = arith.constant 0 : index
    %1 = vector.load %arg5[%c0_1, %c0_2] : memref<5x128xf32, #tpu.memory_space<vmem>>, vector<5x128xf32>
    %c0_3 = arith.constant 0 : index
    %c0_4 = arith.constant 0 : index
    %2 = vector.load %arg2[%c0_3, %c0_4] : memref<128x128xbf16, #tpu.memory_space<vmem>>, vector<128x128xbf16>
    %cst = arith.constant dense<0.000000e+00> : vector<128x128xf32>
    %3 = tpu.matmul %0, %2, %cst {dimension_numbers = #tpu.dot_dimension_numbers<[1], [0], [0], [1], [0, 0, 1, 1], [], []>} : vector<128x128xbf16>, vector<128x128xbf16>, vector<128x128xf32> -> vector<128x128xf32>
    %4 = vector.extract_strided_slice %1 {offsets = [0, 0], sizes = [1, 128], strides = [1, 1]} : vector<5x128xf32> to vector<1x128xf32>
    %5 = vector.broadcast %4 : vector<1x128xf32> to vector<128x128xf32>
    %6 = arith.addf %3, %5 : vector<128x128xf32>
    %cst_5 = arith.constant 0.000000e+00 : f32
    %7 = vector.broadcast %cst_5 : f32 to vector<128x128xf32>
    %8 = arith.maximumf %6, %7 : vector<128x128xf32>
    %9 = vector.shape_cast %8 : vector<128x128xf32> to vector<8x16x128xf32>
    %cst_6 = arith.constant dense<0.000000e+00> : vector<8x128xf32>
    %10 = vector.multi_reduction <add>, %9, %cst_6 [1] : vector<8x16x128xf32> to vector<8x128xf32>
    %11 = vector.extract_strided_slice %1 {offsets = [1, 0], sizes = [1, 128], strides = [1, 1]} : vector<5x128xf32> to vector<1x128xf32>
    %12 = vector.broadcast %11 : vector<1x128xf32> to vector<8x128xf32>
    %13 = arith.mulf %12, %10 : vector<8x128xf32>
    %14 = vector.extract_strided_slice %1 {offsets = [2, 0], sizes = [1, 128], strides = [1, 1]} : vector<5x128xf32> to vector<1x128xf32>
    %15 = vector.extract_strided_slice %9 {offsets = [0, 15, 0], sizes = [8, 1, 128], strides = [1, 1, 1]} : vector<8x16x128xf32> to vector<8x1x128xf32>
    %16 = vector.shape_cast %15 : vector<8x1x128xf32> to vector<8x128xf32>
    %17 = vector.broadcast %14 : vector<1x128xf32> to vector<8x128xf32>
    %18 = arith.mulf %17, %16 : vector<8x128xf32>
    %19 = arith.subf %13, %18 : vector<8x128xf32>
    %20 = vector.extract_strided_slice %1 {offsets = [3, 0], sizes = [1, 128], strides = [1, 1]} : vector<5x128xf32> to vector<1x128xf32>
    %21 = vector.extract_strided_slice %9 {offsets = [0, 0, 0], sizes = [8, 1, 128], strides = [1, 1, 1]} : vector<8x16x128xf32> to vector<8x1x128xf32>
    %22 = vector.shape_cast %21 : vector<8x1x128xf32> to vector<8x128xf32>
    %23 = vector.broadcast %20 : vector<1x128xf32> to vector<8x128xf32>
    %24 = arith.mulf %23, %22 : vector<8x128xf32>
    %25 = arith.subf %19, %24 : vector<8x128xf32>
    %26 = vector.shape_cast %0 : vector<128x128xbf16> to vector<8x16x128xbf16>
    %27 = arith.extf %26 : vector<8x16x128xbf16> to vector<8x16x128xf32>
    %cst_7 = arith.constant dense<0.000000e+00> : vector<8x128xf32>
    %28 = vector.multi_reduction <add>, %27, %cst_7 [1] : vector<8x16x128xf32> to vector<8x128xf32>
    %29 = arith.truncf %25 : vector<8x128xf32> to vector<8x128xbf16>
    %c0_8 = arith.constant 0 : index
    %c0_9 = arith.constant 0 : index
    %30 = vector.load %arg3[%c0_8, %c0_9] : memref<128x128xbf16, #tpu.memory_space<vmem>>, vector<128x128xbf16>
    %cst_10 = arith.constant dense<0.000000e+00> : vector<8x128xf32>
    %31 = tpu.matmul %29, %30, %cst_10 {dimension_numbers = #tpu.dot_dimension_numbers<[1], [0], [0], [1], [0, 0, 1, 1], [], []>} : vector<8x128xbf16>, vector<128x128xbf16>, vector<8x128xf32> -> vector<8x128xf32>
    %32 = arith.truncf %28 : vector<8x128xf32> to vector<8x128xbf16>
    %c0_11 = arith.constant 0 : index
    %c0_12 = arith.constant 0 : index
    %33 = vector.load %arg4[%c0_11, %c0_12] : memref<128x128xbf16, #tpu.memory_space<vmem>>, vector<128x128xbf16>
    %cst_13 = arith.constant dense<0.000000e+00> : vector<8x128xf32>
    %34 = tpu.matmul %32, %33, %cst_13 {dimension_numbers = #tpu.dot_dimension_numbers<[1], [0], [0], [1], [0, 0, 1, 1], [], []>} : vector<8x128xbf16>, vector<128x128xbf16>, vector<8x128xf32> -> vector<8x128xf32>
    %35 = arith.addf %31, %34 : vector<8x128xf32>
    %36 = vector.extract_strided_slice %1 {offsets = [4, 0], sizes = [1, 128], strides = [1, 1]} : vector<5x128xf32> to vector<1x128xf32>
    %37 = vector.broadcast %36 : vector<1x128xf32> to vector<8x128xf32>
    %38 = arith.addf %35, %37 : vector<8x128xf32>
    %c0_14 = arith.constant 0 : index
    %c0_15 = arith.constant 0 : index
    %39 = vector.load %arg6[%c0_14, %c0_15] : memref<8x128xf32, #tpu.memory_space<vmem>>, vector<8x128xf32>
    tpu.vector_store %arg6[%c0_14, %c0_15], %38 {strides = array<i32>} : memref<8x128xf32, #tpu.memory_space<vmem>>, vector<8x128xf32>,
    return
  }
  func.func @transform_0(%arg0: i32) -> (i32, i32) {
    %c0_i32 = arith.constant 0 : i32
    %c0_i32_0 = arith.constant 0 : i32
    return %arg0, %c0_i32 : i32, i32
  }
  func.func @transform_1(%arg0: i32) -> (i32, i32) {
    %c0_i32 = arith.constant 0 : i32
    %c0_i32_0 = arith.constant 0 : i32
    %c0_i32_1 = arith.constant 0 : i32
    return %c0_i32, %c0_i32_0 : i32, i32
  }
  func.func @transform_2(%arg0: i32) -> (i32, i32) {
    %c0_i32 = arith.constant 0 : i32
    %c0_i32_0 = arith.constant 0 : i32
    %c0_i32_1 = arith.constant 0 : i32
    return %c0_i32, %c0_i32_0 : i32, i32
  }
  func.func @transform_3(%arg0: i32) -> (i32, i32) {
    %c0_i32 = arith.constant 0 : i32
    %c0_i32_0 = arith.constant 0 : i32
    %c0_i32_1 = arith.constant 0 : i32
    return %c0_i32, %c0_i32_0 : i32, i32
  }
  func.func @transform_4(%arg0: i32) -> (i32, i32) {
    %c0_i32 = arith.constant 0 : i32
    %c0_i32_0 = arith.constant 0 : i32
    %c0_i32_1 = arith.constant 0 : i32
    return %c0_i32, %c0_i32_0 : i32, i32
  }
  func.func @transform_5(%arg0: i32) -> (i32, i32) {
    %c0_i32 = arith.constant 0 : i32
    %c0_i32_0 = arith.constant 0 : i32
    return %arg0, %c0_i32 : i32, i32
  }
}

</mosaic_0001>

<bundles_post_ra>
// kernel: tpu_custom_call.1
= control target key start
LH: loop header
LB: loop body
LE: loop exit
PB: predicated region body
PF: predicated region fallthrough
CT: control target
= control target key end

     0   :  { %10 = vsyncpa [#allocation3], 0  ;;  %s1982_s0 = inlined_call_operand.hbm [shape: bf16[256,128], index: 0, kind: input, shape index: {}]   ;;  %s1983_s1 = inlined_call_operand.hbm [shape: bf16[128,128], index: 1, kind: input, shape index: {}]   ;;  %s1984_s2 = inlined_call_operand.hbm [shape: bf16[128,128], index: 2, kind: input, shape index: {}]   ;;  %s1985_s3 = inlined_call_operand.hbm [shape: bf16[128,128], index: 3, kind: input, shape index: {}]   ;;  %s1986_s4 = inlined_call_operand.vmem [shape: f32[5,128], index: 4, kind: input, shape index: {}]   ;;  %s1987_s5 = inlined_call_operand.hbm [shape: f32[16,128], index: 5, kind: output, shape index: {}]  }
   0x1   :  { %12 = vsyncpa [#allocation3 + $0x1], 0 }
   0x2   :  { %13 = vsyncpa [#allocation6], 0 }
   0x3   :  { %14 = vsyncpa [#allocation9], 0 }
   0x4   :  { %15 = vsyncpa [#allocation4], 0 }
   0x5   :  { %17 = vsyncpa [#allocation4 + $0x1], 0  ;;  %s1618_s18 = smov 0   ;;  %s1620_s19 = smov 0  }
   0x6   :  { %s1622_s20 = smov 0   ;;  %s1624_s21 = smov 0  }
   0x7 LB: > { %s1639_s22 = sadd.s32 4294967295, %s1577_s21   ;;  %s1110_s23 = sadd.s32 4294967294, %s1577_s21   ;;  %s1577_s21 = sphi %s1624_s21, %s2010_s21   ;;  %s1573_s20 = sphi %s1622_s20, %s2009_s20   ;;  %s1569_s19 = sphi %s1620_s19, %s2008_s19   ;;  %s1565_s18 = sphi %s1618_s18, %s2007_s18  }
   0x8   : > { %p43_p0 = scmp.ne.s32.totalorder %s1569_s19, %s1565_s18  ;;  %p1988_p1 = scmp.eq.s32.totalorder %s1639_s22, 0 }
   0x9   : > { %p157_p3 = scmp.eq.s32.totalorder %s1110_s23, 1  ;;  %p1111_p5 = scmp.ge.s32.totalorder %s1577_s21, 1 }
   0xa   : > { %p1648_p4 = por %p1988_p1, %p43_p0  ;;  %p164_p7 = scmp.lt.s32.totalorder %s1577_s21, 3 }
   0xb   : > { %p1653_p6 = por %p157_p3, %p43_p0  ;;  %s1579_s27 = smov [#allocation5]  }
   0xc   : > { %s1991_s24 = scalar_select %p1648_p4, 1, 0 }
   0xd   : > { %s1992_s25 = scalar_select %p1653_p6, 1, 0 }
   0xe   : > { %p1658_p8 = pnand %p1111_p5, %p164_p7  ;;  %s176_s28 = sshll.u32 %s1579_s27, 4  ;;  %s1662_s28 = int_to_ptr.vmem [resolvable:$true] %s176_s28 }
   0xf   : > { %s1580_s30 = smov [#allocation7]   ;;  %s1581_s7 = smov [#allocation8]  }
  0x10   : > { %s1993_s26 = scalar_select %p1658_p8, 1, 0 }
  0x11   : > { %p1284_p9 = pneg %p1658_p8  ;;  %s189_s6 = sshll.u32 %s1580_s30, 4  ;;  %s1673_s6 = int_to_ptr.vmem [resolvable:$true] %s189_s6 }
  0x12   : > { %s1675_s8 = sshll.u32 %s1581_s7, 4  ;;  %s1389_s11 = scalar_lea.hbm %s1983_s1, 1024  ;;  %s203_s8 = int_to_ptr.vmem [resolvable:$true] %s1675_s8 }
  0x13   : > { %p1669_p11 = pnand %p1284_p9, %p1988_p1  ;;  %p1390_p12 = scmp.ne.s32.totalorder %s1983_s1, %s1389_s11 }
  0x14   : > { %p1396_p5 = scmp.lt.u32.totalorder %s1389_s11, %s1983_s1 }
  0x15   : > { %p1685_p13 = pneg %p1669_p11 }
  0x17   : > { %p1392_p0 = pnand %p1685_p13, %p1390_p12 }
  0x19   : > { %p1393_p3 = pneg %p1392_p0 }
  0x1b   : > { %p1398_p7 = pnand %p1396_p5, %p1393_p3 }
  0x1d   : > { %1401 = shalt.err (!%p1398_p7)
}
  0x1e   : > { %s1402_s17 = scalar_lea.vmem %s1662_s28, 1024  ;;  %p1410_p2 = scmp.lt.s32.totalorder %s1662_s28, %s1662_s28 }
  0x1f   : > { %p1403_p9 = scmp.ne.s32.totalorder %s1662_s28, %s1402_s17  ;;  %p1411_p6 = scmp.lt.s32.totalorder %s1402_s17, %s1402_s17 }
  0x21   : > { %p1405_p10 = pnand %p1403_p9, %p1685_p13  ;;  %p1412_p12 = por %p1411_p6, %p1410_p2 }
  0x23   : > { %p1406_p1 = pneg %p1405_p10 }
  0x25   : > { %p1413_p0 = pnand %p1412_p12, %p1406_p1 }
  0x27   : > { %1416 = shalt.err (!%p1413_p0)
}
  0x28   : > { %s1582_s23 = smov 64   ;;  %s1583_s27 = smov 4  }
  0x29   : > { %1287 = dma.hbm_to_vmem [thread:$0]  (!%p1669_p11), %s1983_s1, 1024, %s1662_s28, [#allocation6], %s1582_s23, %s1582_s23, %s1583_s27  }
  0x2a   : > { %s1417_s11 = scalar_lea.hbm %s1984_s2, 1024 }
  0x2b   : > { %p1418_p1 = scmp.ne.s32.totalorder %s1984_s2, %s1417_s11  ;;  %p1424_p10 = scmp.lt.u32.totalorder %s1417_s11, %s1984_s2 }
  0x2d   : > { %p1420_p2 = pnand %p1418_p1, %p1685_p13 }
  0x2f   : > { %p1421_p6 = pneg %p1420_p2 }
  0x31   : > { %p1426_p3 = pnand %p1424_p10, %p1421_p6 }
  0x33   : > { %1429 = shalt.err (!%p1426_p3)
}
  0x34   : > { %s1430_s28 = scalar_lea.vmem %s1673_s6, 1024  ;;  %p1438_p12 = scmp.lt.s32.totalorder %s1673_s6, %s1673_s6 }
  0x35   : > { %p1431_p5 = scmp.ne.s32.totalorder %s1673_s6, %s1430_s28  ;;  %p1439_p0 = scmp.lt.s32.totalorder %s1430_s28, %s1430_s28 }
  0x37   : > { %p1433_p7 = pnand %p1431_p5, %p1685_p13  ;;  %p1440_p1 = por %p1439_p0, %p1438_p12 }
  0x39   : > { %p1434_p9 = pneg %p1433_p7 }
  0x3b   : > { %p1441_p2 = pnand %p1440_p1, %p1434_p9 }
  0x3d   : > { %1444 = shalt.err (!%p1441_p2)
}
  0x3e   : > { %1290 = dma.hbm_to_vmem [thread:$0]  (!%p1669_p11), %s1984_s2, 1024, %s1673_s6, [#allocation6], %s1582_s23, %s1582_s23, %s1583_s27  }
  0x3f   : > { %s1445_s10 = scalar_lea.hbm %s1985_s3, 1024 }
  0x40   : > { %p1446_p6 = scmp.ne.s32.totalorder %s1985_s3, %s1445_s10  ;;  %p1452_p5 = scmp.lt.u32.totalorder %s1445_s10, %s1985_s3 }
  0x42   : > { %p1448_p10 = pnand %p1446_p6, %p1685_p13 }
  0x44   : > { %p1449_p3 = pneg %p1448_p10 }
  0x46   : > { %p1454_p7 = pnand %p1452_p5, %p1449_p3 }
  0x48   : > { %1457 = shalt.err (!%p1454_p7)
}
  0x49   : > { %s1458_s16 = scalar_lea.vmem %s203_s8, 1024  ;;  %p1466_p1 = scmp.lt.s32.totalorder %s203_s8, %s203_s8 }
  0x4a   : > { %p1459_p9 = scmp.ne.s32.totalorder %s203_s8, %s1458_s16  ;;  %p1467_p2 = scmp.lt.s32.totalorder %s1458_s16, %s1458_s16 }
  0x4c   : > { %p1461_p12 = pnand %p1459_p9, %p1685_p13  ;;  %p1468_p4 = por %p1467_p2, %p1466_p1 }
  0x4e   : > { %p1462_p0 = pneg %p1461_p12 }
  0x50   : > { %p1469_p8 = pnand %p1468_p4, %p1462_p0 }
  0x52   : > { %1472 = shalt.err (!%p1469_p8)
}
  0x53   : > { %1293 = dma.hbm_to_vmem [thread:$0]  (!%p1669_p11), %s1985_s3, 1024, %s203_s8, [#allocation9], %s1582_s23, %s1582_s23, %s1583_s27  }
  0x54   : > { %s1758_s14 = sadd.s32 1, %s1577_s21   ;;  %s30_s17 = sadd.s32 1, %s1573_s20 }
  0x55   : > { %s27_s29 = ssub.s32 %s1577_s21, %s1758_s14  ;;  %p37_p8 = scmp.ne.s32.totalorder %s1573_s20, %s1569_s19 }
  0x56   : > { %p28_p4 = scmp.eq.s32.totalorder %s27_s29, 0  ;;  %p38_p13 = scmp.eq.s32.totalorder %s1577_s21, 0 }
  0x57   : > { %p1305_p6 = scmp.lt.s32.totalorder %s1577_s21, 2  ;;  %p1996_p3 = scmp.eq.s32.totalorder %s1639_s22, 1 }
  0x58   : > { %s1768_s30 = scalar_select %p28_p4, %s1573_s20, %s30_s17  }
  0x59   : > { %p39_p10 = por %p38_p13, %p37_p8  ;;  %p1772_p5 = por %p1996_p3, %p37_p8 }
  0x5a   : > { %s219_s9 = sand.u32 1, %s1573_s20   ;;  %s1161_s10 = sshll.u32 %s1577_s21, 10 }
  0x5b   : > { %s1116_s8 = sshll.u32 %s219_s9, 6  ;;  %s1781_s13 = scalar_lea.hbm %s1982_s0, %s1161_s10 }
  0x5c   : > { %s223_s15 = scalar_lea.vmem [#allocation2], %s1116_s8  ;;  %p1783_p11 = pnand %p1305_p6, %p39_p10 }
  0x5d   : > { %s230_s16 = sshll.u32 %s223_s15, 4  ;;  %s1789_s28 = scalar_lea.sflag [#allocation3], %s219_s9  ;;  %s1787_s16 = int_to_ptr.vmem [resolvable:$true] %s230_s16 }
  0x5e   : > { %s1473_s29 = scalar_lea.hbm %s1781_s13, 1024  ;;  %p1475_p9 = pneg %p1783_p11 }
  0x5f   : > { %p1474_p7 = scmp.ne.s32.totalorder %s1781_s13, %s1473_s29  ;;  %s1478_s8 = scalar_lea.hbm %s1982_s0, 2048 }
  0x60   : > { %p1479_p1 = scmp.lt.u32.totalorder %s1781_s13, %s1982_s0  ;;  %p1480_p2 = scmp.lt.u32.totalorder %s1478_s8, %s1473_s29 }
  0x61   : > { %p1476_p12 = pnand %p1475_p9, %p1474_p7  ;;  %p1482_p8 = scmp.lt.u32.totalorder %s1473_s29, %s1781_s13 }
  0x62   : > { %p1481_p4 = por %p1480_p2, %p1479_p1 }
  0x63   : > { %p1477_p0 = pneg %p1476_p12 }
  0x64   : > { %p1483_p13 = por %p1482_p8, %p1481_p4 }
  0x66   : > { %p1484_p6 = pnand %p1483_p13, %p1477_p0 }
  0x68   : > { %1487 = shalt.err (!%p1484_p6)
}
  0x69   : > { %s1488_s9 = scalar_lea.vmem %s1787_s16, 1024  ;;  %s1584_s15 = smov [#allocation2]  }
  0x6a   : > { %p1489_p10 = scmp.ne.s32.totalorder %s1787_s16, %s1488_s9  ;;  %s1493_s17 = sshll.u32 %s1584_s15, 4  ;;  %s1494_s17 = int_to_ptr.vmem [resolvable:$false] %s1493_s17 }
  0x6b   : > { %s1495_s10 = scalar_lea.vmem %s1494_s17, 2048  ;;  %p1496_p12 = scmp.lt.s32.totalorder %s1787_s16, %s1494_s17 }
  0x6c   : > { %p1491_p3 = pnand %p1489_p10, %p1475_p9  ;;  %p1497_p1 = scmp.lt.s32.totalorder %s1495_s10, %s1488_s9 }
  0x6e   : > { %p1492_p7 = pneg %p1491_p3  ;;  %p1498_p2 = por %p1497_p1, %p1496_p12 }
  0x70   : > { %p1499_p4 = pnand %p1498_p2, %p1492_p7 }
  0x72   : > { %1502 = shalt.err (!%p1499_p4)
}
  0x73   : > { %1297 = dma.hbm_to_vmem [thread:$0]  (!%p1783_p11), %s1781_s13, 1024, %s1787_s16, %s1789_s28, %s1582_s23, %s1582_s23, %s1583_s27  }
  0x74   : > { %p1999_p9 = scmp.ne.s32.totalorder %s1993_s26, 0 }
  0x75   : > { %s1823_s29 = sand.u32 (!%p1999_p9), 1, %s1569_s19   ;;  %p2000_p0 = scmp.ne.s32.totalorder (!%p1999_p9), %s1991_s24, 0 }
  0x76   : > { %242 = sbr.rel (%p1999_p9) target bundleno = 663 (0x297), region = 40  ;;  %s1120_s8 = sshll.u32 (!%p1999_p9), %s1823_s29, 6 }
  0x77   : > { %s245_s11 = scalar_lea.sflag (!%p1999_p9), [#allocation3], %s1823_s29  ;;  %s1827_s12 = scalar_lea.vmem (!%p1999_p9), [#allocation2], %s1120_s8 }
  0x7d   : > { %1548 = dma.done.wait (%p2000_p0), %s245_s11, 1024  }
  0x7e   : > { %1550 = vsyncadd (%p2000_p0), %s245_s11, 4294966272  ;;  %p2001_p11 = scmp.eq.s32.totalorder %s1639_s22, 0 }
  0x80   : > { %1552 = dma.done.wait (%p2001_p11), [#allocation6], 2048   ;;  %p2002_p8 = pmov %p2001_p11 }
  0x82   : > { %1554 = vsyncadd (%p2002_p8), [#allocation6], 4294965248  ;;  %p2003_p13 = pmov %p2002_p8 }
  0x83   : > { %p2004_p6 = pmov %p2002_p8 }
  0x84   : > { %1556 = dma.done.wait (%p2003_p13), [#allocation9], 1024  }
  0x85   : > { %1558 = vsyncadd (%p2004_p6), [#allocation9], 4294966272  ;;  %v1349_v0 = vld [vmem:[#allocation5] sm:$0xff]   ;;  %v1350_v1 = vld [vmem:[#allocation5 + $0x8] sm:$0xff]   ;;  %vm603_vm0 = vcmask 1041409   ;;  %vm605_vm1 = vcmask 1042434  }
  0x86   : > { %1196 = vmatprep.subr.bf16.mxu0 %v1349_v0  ;;  %v1351_v2 = vld [vmem:[#allocation5 + $0x10] sm:$0xff]   ;;  %v1352_v3 = vld [vmem:[#allocation5 + $0x18] sm:$0xff]   ;;  %v289_v4 = vld [vmem:[%s1827_s12] sm:$0xff]   ;;  %vm607_vm2 = vcmask 1043459   ;;  %vm1586_vm3 = vmmov 0   ;;  %vm609_vm4 = vcmask 1044484  }
  0x87   : > { %1197 = vmatpush3.bf16.msra.mxu0 %v1349_v0  ;;  %v1353_v5 = vld [vmem:[#allocation5 + $0x20] sm:$0xff]   ;;  %1212 = vmatprep.mubr.bf16.mxu0 %v289_v4  ;;  %v1354_v6 = vld [vmem:[#allocation5 + $0x28] sm:$0xff]   ;;  %v1355_v7 = vld [vmem:[#allocation5 + $0x30] sm:$0xff]   ;;  %v677_v16 = vunpack.c.l.bf16 %v289_v4  ;;  %v678_v17 = vunpack.c.h.bf16 %v289_v4  ;;  %vm611_vm5 = vcmask 1045509   ;;  %vm613_vm6 = vcmask 1046534   ;;  %s1124_s23 = sshll.u32 %s1823_s29, 3 }
  0x88   : > { %1198 = vmatprep.subr.bf16.mxu0 %v1350_v1  ;;  %v1356_v8 = vld [vmem:[#allocation5 + $0x38] sm:$0xff]   ;;  %v291_v9 = vld [vmem:[%s1827_s12 + $0x8] sm:$0xff]   ;;  %v293_v10 = vld [vmem:[%s1827_s12 + $0x10] sm:$0xff]   ;;  %vm615_vm7 = vcmask 1047559   ;;  %s1158_s27 = sshll.u32 %s1639_s22, 7  ;;  %s286_s13 = scalar_lea.vmem [#allocation10], %s1124_s23 }
  0x89   : > { %v295_v11 = vld [vmem:[%s1827_s12 + $0x18] sm:$0xff]   ;;  %v297_v12 = vld [vmem:[%s1827_s12 + $0x20] sm:$0xff]   ;;  %v299_v13 = vld [vmem:[%s1827_s12 + $0x28] sm:$0xff]   ;;  %v679_v18 = vunpack.c.l.bf16 %v291_v9  ;;  %v680_v19 = vunpack.c.h.bf16 %v291_v9  ;;  %v693_v20 = vadd.f32 %v678_v17, %v677_v16  ;;  %v681_v38 = vunpack.c.l.bf16 %v293_v10  ;;  %s1011_s16 = sshll.u32 %s286_s13, 4  ;;  %s1938_s9 = scalar_lea.hbm %s1987_s5, %s1158_s27  ;;  %s1940_s16 = int_to_ptr.vmem [resolvable:$true] %s1011_s16 }
  0x8a   : > { %v301_v14 = vld [vmem:[%s1827_s12 + $0x30] sm:$0xff]   ;;  %v303_v15 = vld [vmem:[%s1827_s12 + $0x38] sm:$0xff]   ;;  %v682_v39 = vunpack.c.h.bf16 %v293_v10  ;;  %v683_v41 = vunpack.c.l.bf16 %v295_v11  ;;  %v684_v42 = vunpack.c.h.bf16 %v295_v11  ;;  %v685_v43 = vunpack.c.l.bf16 %v297_v12  ;;  %v1365_v62 = vld [vmem:[#allocation8] sm:$0xff]   ;;  %s998_s15 = scalar_lea.sflag [#allocation4], %s1823_s29  ;;  %s1503_s22 = scalar_lea.vmem %s1940_s16, 128 }
  0x8b   : > { %1199 = vmatpush3.bf16.msra.mxu0 %v1350_v1  ;;  %v700_v21 = vadd.f32 %v680_v19, %v679_v18  ;;  %v694_v22 = vrot.slane %v693_v20, 4  ;;  %v686_v44 = vunpack.c.h.bf16 %v297_v12  ;;  %v687_v48 = vunpack.c.l.bf16 %v299_v13  ;;  %v1366_v4 = vld [vmem:[#allocation7] sm:$0xff]   ;;  %p1504_p10 = scmp.ne.s32.totalorder %s1940_s16, %s1503_s22  ;;  %s1587_s17 = smov [#allocation10]  }
  0x8c   : > { %1200 = vmatprep.subr.bf16.mxu0 %v1351_v2  ;;  %v707_v45 = vadd.f32 %v682_v39, %v681_v38  ;;  %v714_v46 = vadd.f32 %v684_v42, %v683_v41  ;;  %v688_v49 = vunpack.c.h.bf16 %v299_v13  ;;  %v689_v55 = vunpack.c.l.bf16 %v301_v14  ;;  %v1375_v38 = vld [vmem:[#allocation8 + $0x28] sm:$0xff]   ;;  %s1507_s10 = sshll.u32 %s1587_s17, 4  ;;  %s1508_s10 = int_to_ptr.vmem [resolvable:$false] %s1507_s10 }
  0x8d   : > { %v701_v23 = vrot.slane %v700_v21, 4  ;;  %v695_v24 = vadd.f32 %v694_v22, %v693_v20  ;;  %v721_v47 = vadd.f32 %v686_v44, %v685_v43  ;;  %v690_v56 = vunpack.c.h.bf16 %v301_v14  ;;  %v1370_v20 = vld [vmem:[#allocation7 + $0x10] sm:$0xff]   ;;  %p1505_p3 = pnand %p1504_p10, %p1772_p5  ;;  %s1509_s8 = scalar_lea.vmem %s1508_s10, 256 }
  0x8e   : > { %v708_v50 = vrot.slane %v707_v45, 4  ;;  %v715_v51 = vrot.slane %v714_v46, 4  ;;  %v728_v53 = vadd.f32 %v688_v49, %v687_v48  ;;  %v691_v60 = vunpack.c.l.bf16 %v303_v15  ;;  %v1377_v48 = vld [vmem:[#allocation8 + $0x30] sm:$0xff]   ;;  %p1510_p12 = scmp.lt.s32.totalorder %s1940_s16, %s1508_s10  ;;  %p1511_p1 = scmp.lt.s32.totalorder %s1509_s8, %s1503_s22 }
  0x8f   : > { %1201 = vmatpush3.bf16.msra.mxu0 %v1351_v2  ;;  %v702_v25 = vadd.f32 %v701_v23, %v700_v21  ;;  %v696_v26 = vrot.slane %v695_v24, 2  ;;  %v722_v52 = vrot.slane %v721_v47, 4  ;;  %v692_v61 = vunpack.c.h.bf16 %v303_v15  ;;  %v1371_v23 = vld [vmem:[#allocation8 + $0x18] sm:$0xff]   ;;  %p1506_p7 = pneg %p1505_p3 }
  0x90   : > { %1202 = vmatprep.subr.bf16.mxu0 %v1352_v3  ;;  %v709_v54 = vadd.f32 %v708_v50, %v707_v45  ;;  %v716_v57 = vadd.f32 %v715_v51, %v714_v46  ;;  %v729_v59 = vrot.slane %v728_v53, 4  ;;  %v735_v0 = vadd.f32 %v690_v56, %v689_v55  ;;  %v1376_v46 = vld [vmem:[#allocation7 + $0x28] sm:$0xff]   ;;  %v1378_v51 = vld [vmem:[#allocation7 + $0x30] sm:$0xff]   ;;  %p1512_p2 = por %p1511_p1, %p1510_p12 }
  0x91   : > { %v703_v27 = vrot.slane %v702_v25, 2  ;;  %v697_v28 = vadd.f32 %v696_v26, %v695_v24  ;;  %v723_v58 = vadd.f32 %v722_v52, %v721_v47  ;;  %v1585_v1 = vmov 0.0  }
  0x92   : > { %v710_v63 = vrot.slane %v709_v54, 2  ;;  %1228 = vmatprep.subr.bf16.mxu1 %v1585_v1  ;;  %v717_v2 = vrot.slane %v716_v57, 2  ;;  %1244 = vmatprep.mubr.msk.bf16.mxu1 %vm1586_vm3, %v1585_v1  ;;  %p1513_p4 = pnand %p1512_p2, %p1506_p7 }
  0x93   : > { %1203 = vmatpush3.bf16.msra.mxu0 %v1352_v3  ;;  %v704_v29 = vadd.f32 %v703_v27, %v702_v25  ;;  %v698_v30 = vrot.slane %v697_v28, 1  ;;  %1229 = vmatpush3.bf16.msra.mxu1 %v1365_v62  ;;  %v724_v3 = vrot.slane %v723_v58, 2 }
  0x94   : > { %1204 = vmatprep.subr.bf16.mxu0 %v1353_v5  ;;  %1230 = vmatprep.subr.bf16.mxu1 %v1585_v1 }
  0x95   : > { %v705_v31 = vrot.slane %v704_v29, 1  ;;  %v699_v32 = vadd.f32 %v698_v30, %v697_v28  ;;  %v1372_v28 = vld [vmem:[#allocation7 + $0x18] sm:$0xff]  }
  0x97   : > { %1205 = vmatpush3.bf16.msra.mxu0 %v1353_v5  ;;  %v706_v33 = vadd.f32 %v705_v31, %v704_v29  ;;  %v766_v34 = vpack.c.bf16 %v699_v32, %v699_v32  ;;  %v730_v5 = vadd.f32 %v729_v59, %v728_v53  ;;  %v1373_v31 = vld [vmem:[#allocation8 + $0x20] sm:$0xff]  }
  0x98   : > { %1206 = vmatprep.subr.bf16.mxu0 %v1354_v6 }
  0x99   : > { %v767_v35 = vpack.c.bf16 %v706_v33, %v706_v33  ;;  %v798_v36 = vunpack.c.l.b16 %v766_v34 }
  0x9b   : > { %1207 = vmatpush3.bf16.msra.mxu0 %v1354_v6  ;;  %v799_v37 = vunpack.c.l.b16 %v767_v35  ;;  %v742_v6 = vadd.f32 %v692_v61, %v691_v60  ;;  %v1380_v61 = vld [vmem:[#allocation7 + $0x38] sm:$0xff]  }
  0x9c   : > { %1208 = vmatprep.subr.bf16.mxu0 %v1355_v7 }
  0x9d   : > { %v1850_v40 = vsel %vm603_vm0, %v799_v37, %v798_v36  ;;  %v1374_v36 = vld [vmem:[#allocation7 + $0x20] sm:$0xff]  }
  0x9f   : > { %1209 = vmatpush3.bf16.msra.mxu0 %v1355_v7  ;;  %v1367_v7 = vld [vmem:[#allocation8 + $0x8] sm:$0xff]  }
  0xa0   : > { %1210 = vmatprep.subr.bf16.mxu0 %v1356_v8  ;;  %1231 = vmatpush3.bf16.msra.mxu1 %v1367_v7 }
  0xa1   : > { %1232 = vmatprep.subr.bf16.mxu1 %v1585_v1 }
  0xa3   : > { %1211 = vmatpush3.bf16.msra.mxu0 %v1356_v8  ;;  %v711_v8 = vadd.f32 %v710_v63, %v709_v54  ;;  %v1379_v54 = vld [vmem:[#allocation8 + $0x38] sm:$0xff]  }
  0xa4   : > { %1248 = vmatprep.subr.bf16.mxu0 %v1585_v1 }
  0xa5   : > { %v712_v16 = vrot.slane %v711_v8, 1 }
  0xa6   : > { %1213 = vmatmul.mubr.bf16.vlgmr.msra.gmra.mrb[0].mxu0 %v291_v9  ;;  %v736_v9 = vrot.slane %v735_v0, 4 }
  0xa7   : > { %1216 = vmatprep.mubr.bf16.mxu0 %v293_v10  ;;  %1249 = vmatpush3.bf16.msra.mxu0 %v1366_v4  ;;  %v718_v10 = vadd.f32 %v717_v2, %v716_v57  ;;  %v713_v24 = vadd.f32 %v712_v16, %v711_v8  ;;  %v322_v2 = vlaneseq }
  0xa8   : > { %1250 = vmatprep.subr.bf16.mxu0 %v1585_v1  ;;  %v737_v17 = vadd.f32 %v736_v9, %v735_v0 }
  0xa9   : > { %v719_v18 = vrot.slane %v718_v10, 1  ;;  %v768_v32 = vpack.c.bf16 %v713_v24, %v713_v24 }
  0xaa   : > { %v738_v25 = vrot.slane %v737_v17, 2 }
  0xab   : > { %v720_v26 = vadd.f32 %v719_v18, %v718_v10  ;;  %v800_v41 = vunpack.c.l.b16 %v768_v32 }
  0xac   : > { %v739_v33 = vadd.f32 %v738_v25, %v737_v17 }
  0xad   : > { %v769_v34 = vpack.c.bf16 %v720_v26, %v720_v26  ;;  %v807_v53 = vsel %vm605_vm1, %v800_v41, %v1850_v40 }
  0xae   : > { %1217 = vmatmul.mubr.bf16.gmra.mrb[4].mxu0 %v295_v11  ;;  %v725_v11 = vadd.f32 %v724_v3, %v723_v58  ;;  %v740_v42 = vrot.slane %v739_v33, 1  ;;  %v1877_v3 = vshrl.u32 %v322_v2, 7 }
  0xaf   : > { %1220 = vmatprep.mubr.bf16.mxu0 %v297_v12  ;;  %v1368_v12 = vld [vmem:[#allocation7 + $0x8] sm:$0xff]   ;;  %v801_v43 = vunpack.c.l.b16 %v769_v34 }
  0xb0   : > { %1251 = vmatpush3.bf16.msra.mxu0 %v1368_v12  ;;  %v726_v19 = vrot.slane %v725_v11, 1  ;;  %v741_v47 = vadd.f32 %v740_v42, %v739_v33  ;;  %v324_v4 = vsub.s32 0, %v1877_v3 }
  0xb1   : > { %1252 = vmatprep.subr.bf16.mxu0 %v1585_v1  ;;  %v808_v57 = vsel %vm607_vm2, %v801_v43, %v807_v53 }
  0xb2   : > { %v727_v27 = vadd.f32 %v726_v19, %v725_v11  ;;  %v772_v52 = vpack.c.bf16 %v741_v47, %v741_v47 }
  0xb4   : > { %1253 = vmatpush3.bf16.msra.mxu0 %v1370_v20  ;;  %v770_v35 = vpack.c.bf16 %v727_v27, %v727_v27  ;;  %v804_v58 = vunpack.c.l.b16 %v772_v52 }
  0xb5   : > { %1254 = vmatprep.subr.bf16.mxu0 %v1585_v1 }
  0xb6   : > { %1221 = vmatmul.mubr.bf16.gmra.mrb[8].mxu0 %v299_v13  ;;  %v731_v13 = vrot.slane %v730_v5, 2  ;;  %v802_v45 = vunpack.c.l.b16 %v770_v35 }
  0xb7   : > { %1224 = vmatprep.mubr.bf16.mxu0 %v301_v14  ;;  %v743_v14 = vrot.slane %v742_v6, 4 }
  0xb8   : > { %v732_v21 = vadd.f32 %v731_v13, %v730_v5  ;;  %1255 = vmatpush3.bf16.msra.mxu0 %v1372_v28  ;;  %v809_v59 = vsel %vm609_vm4, %v802_v45, %v808_v57  ;;  %v1883_v5 = vld [vmem:[%s1986_s4] sm:$0x1f] }
  0xb9   : > { %v744_v22 = vadd.f32 %v743_v14, %v742_v6  ;;  %1256 = vmatprep.subr.bf16.mxu0 %v1585_v1  ;;  %v1886_v6 = vrot.slane %v1883_v5, %v324_v4 }
  0xba   : > { %v733_v29 = vrot.slane %v732_v21, 1 }
  0xbb   : > { %v745_v30 = vrot.slane %v744_v22, 2 }
  0xbc   : > { %v734_v37 = vadd.f32 %v733_v29, %v732_v21  ;;  %1257 = vmatpush3.bf16.msra.mxu0 %v1374_v36 }
  0xbd   : > { %v746_v39 = vadd.f32 %v745_v30, %v744_v22  ;;  %1258 = vmatprep.subr.bf16.mxu0 %v1585_v1 }
  0xbe   : > { %1225 = vmatmul.mubr.bf16.gmra.mrb[12].mxu0 %v303_v15  ;;  %v1369_v15 = vld [vmem:[#allocation8 + $0x10] sm:$0xff]   ;;  %v771_v50 = vpack.c.bf16 %v734_v37, %v734_v37 }
  0xbf   : > { %1233 = vmatpush3.bf16.msra.mxu1 %v1369_v15  ;;  %v747_v44 = vrot.slane %v746_v39, 1  ;;  %1264 = vmatprep.mubr.msk.bf16.mxu0 %vm1586_vm3, %v1585_v1 }
  0xc0   : > { %1234 = vmatprep.subr.bf16.mxu1 %v1585_v1  ;;  %1259 = vmatpush3.bf16.msra.mxu0 %v1376_v46  ;;  %v803_v56 = vunpack.c.l.b16 %v771_v50 }
  0xc1   : > { %v748_v49 = vadd.f32 %v747_v44, %v746_v39  ;;  %1260 = vmatprep.subr.bf16.mxu0 %v1585_v1 }
  0xc2   : > { %v810_v40 = vsel %vm611_vm5, %v803_v56, %v809_v59 }
  0xc3   : > { %1235 = vmatpush3.bf16.msra.mxu1 %v1371_v23  ;;  %v773_v55 = vpack.c.bf16 %v748_v49, %v748_v49  ;;  %v811_v62 = vsel %vm613_vm6, %v804_v58, %v810_v40 }
  0xc4   : > { %1236 = vmatprep.subr.bf16.mxu1 %v1585_v1  ;;  %1261 = vmatpush3.bf16.msra.mxu0 %v1378_v51 }
  0xc5   : > { %v805_v60 = vunpack.c.l.b16 %v773_v55  ;;  %1262 = vmatprep.subr.bf16.mxu0 %v1585_v1 }
  0xc7   : > { %1237 = vmatpush3.bf16.msra.mxu1 %v1373_v31  ;;  %v812_v63 = vsel %vm615_vm7, %v805_v60, %v811_v62 }
  0xc8   : > { %1238 = vmatprep.subr.bf16.mxu1 %v1585_v1  ;;  %v813_v0 = vpack.c.b16 %v812_v63, %v812_v63  ;;  %1263 = vmatpush3.bf16.msra.mxu0 %v1380_v61 }
  0xcb   : > { %1239 = vmatpush3.bf16.msra.mxu1 %v1375_v38 }
  0xcc   : > { %1240 = vmatprep.subr.bf16.mxu1 %v1585_v1 }
  0xcf   : > { %1241 = vmatpush3.bf16.msra.mxu1 %v1377_v48 }
  0xd0   : > { %1242 = vmatprep.subr.bf16.mxu1 %v1585_v1 }
  0xd3   : > { %1243 = vmatpush3.bf16.msra.mxu1 %v1379_v54 }
  0xd6   : > { %1245 = vmatmul.mubr.bf16.vlgmr.msra.gmra.mrb[0].mxu1 %v813_v0 }
 0x179   : > { %v1214_v7 = vpop.f32.mrb[0].mxu0 }
 0x17a   : > { %v465_v1 = vadd.f32 %v1214_v7, %v1886_v6  ;;  %v456_v8 = vpop.f32.mrb[1].mxu0 }
 0x17b   : > { %v457_v9 = vadd.f32 %v456_v8, %v1886_v6  ;;  %v1215_v10 = vpop.f32.mrb[2].mxu0 }
 0x17c   : > { %v521_v11 = vmax.f32 %v465_v1, 0.0  ;;  %v468_v12 = vadd.f32 %v1215_v10, %v1886_v6  ;;  %v459_v13 = vpop.f32.mrb[3].mxu0 }
 0x17d   : > { %v519_v14 = vmax.f32 %v457_v9, 0.0  ;;  %v460_v15 = vadd.f32 %v459_v13, %v1886_v6 }
 0x17e   : > { %v660_v16 = vrot.slane %v521_v11, 7  ;;  %v522_v17 = vmax.f32 %v468_v12, 0.0 }
 0x17f   : > { %v520_v18 = vmax.f32 %v460_v15, 0.0 }
 0x180   : > { %v661_v19 = vsel %vm603_vm0, %v660_v16, %v519_v14  ;;  %v542_v20 = vadd.f32 %v522_v17, %v521_v11  ;;  %v632_v21 = vrot.slane %v522_v17, 6 }
 0x181   : > { %v535_v22 = vadd.f32 %v520_v18, %v519_v14  ;;  %v631_v23 = vrot.slane %v520_v18, 7  ;;  %v1218_v24 = vpop.f32.mrb[4].mxu0 }
 0x182   : > { %v543_v25 = vrot.slane %v542_v20, 4  ;;  %v481_v26 = vadd.f32 %v1218_v24, %v1886_v6  ;;  %v472_v27 = vpop.f32.mrb[5].mxu0 }
 0x183   : > { %v536_v28 = vrot.slane %v535_v22, 4  ;;  %v633_v29 = vsel %vm603_vm0, %v632_v21, %v631_v23  ;;  %v473_v30 = vadd.f32 %v472_v27, %v1886_v6  ;;  %v1219_v31 = vpop.f32.mrb[6].mxu0 }
 0x184   : > { %v544_v32 = vadd.f32 %v543_v25, %v542_v20  ;;  %v525_v33 = vmax.f32 %v481_v26, 0.0  ;;  %v484_v34 = vadd.f32 %v1219_v31, %v1886_v6  ;;  %v475_v35 = vpop.f32.mrb[7].mxu0 }
 0x185   : > { %v537_v36 = vadd.f32 %v536_v28, %v535_v22  ;;  %v523_v37 = vmax.f32 %v473_v30, 0.0  ;;  %v476_v38 = vadd.f32 %v475_v35, %v1886_v6 }
 0x186   : > { %v545_v39 = vrot.slane %v544_v32, 2  ;;  %v526_v41 = vmax.f32 %v484_v34, 0.0  ;;  %v664_v46 = vrot.slane %v525_v33, 5 }
 0x187   : > { %v538_v42 = vrot.slane %v537_v36, 2  ;;  %v662_v43 = vrot.slane %v523_v37, 6  ;;  %v524_v44 = vmax.f32 %v476_v38, 0.0 }
 0x188   : > { %v546_v45 = vadd.f32 %v545_v39, %v544_v32  ;;  %v556_v47 = vadd.f32 %v526_v41, %v525_v33  ;;  %v636_v48 = vrot.slane %v526_v41, 4 }
 0x189   : > { %v539_v49 = vadd.f32 %v538_v42, %v537_v36  ;;  %v663_v50 = vsel %vm605_vm1, %v662_v43, %v661_v19  ;;  %v549_v51 = vadd.f32 %v524_v44, %v523_v37  ;;  %v634_v52 = vrot.slane %v524_v44, 5  ;;  %v1222_v53 = vpop.f32.mrb[8].mxu0 }
 0x18a   : > { %v547_v54 = vrot.slane %v546_v45, 1  ;;  %v557_v55 = vrot.slane %v556_v47, 4  ;;  %v497_v56 = vadd.f32 %v1222_v53, %v1886_v6  ;;  %v488_v57 = vpop.f32.mrb[9].mxu0  ;;  %v665_v58 = vsel %vm607_vm2, %v664_v46, %v663_v50 }
 0x18b   : > { %v540_v59 = vrot.slane %v539_v49, 1  ;;  %v550_v60 = vrot.slane %v549_v51, 4  ;;  %v635_v40 = vsel %vm605_vm1, %v634_v52, %v633_v29  ;;  %v489_v61 = vadd.f32 %v488_v57, %v1886_v6  ;;  %v1223_v62 = vpop.f32.mrb[10].mxu0 }
 0x18c   : > { %v548_v63 = vadd.f32 %v547_v54, %v546_v45  ;;  %v558_v0 = vadd.f32 %v557_v55, %v556_v47  ;;  %v529_v2 = vmax.f32 %v497_v56, 0.0  ;;  %v500_v4 = vadd.f32 %v1223_v62, %v1886_v6  ;;  %v491_v7 = vpop.f32.mrb[11].mxu0 }
 0x18d   : > { %v541_v1 = vadd.f32 %v540_v59, %v539_v49  ;;  %v551_v8 = vadd.f32 %v550_v60, %v549_v51  ;;  %v527_v9 = vmax.f32 %v489_v61, 0.0  ;;  %v492_v10 = vadd.f32 %v491_v7, %v1886_v6 }
 0x18e   : > { %v559_v11 = vrot.slane %v558_v0, 2  ;;  %v530_v12 = vmax.f32 %v500_v4, 0.0  ;;  %v637_v13 = vsel %vm607_vm2, %v636_v48, %v635_v40  ;;  %v668_v19 = vrot.slane %v529_v2, 3 }
 0x18f   : > { %v604_v14 = vsel %vm603_vm0, %v548_v63, %v541_v1  ;;  %v552_v15 = vrot.slane %v551_v8, 2  ;;  %v666_v16 = vrot.slane %v527_v9, 4  ;;  %v528_v17 = vmax.f32 %v492_v10, 0.0 }
 0x190   : > { %v560_v18 = vadd.f32 %v559_v11, %v558_v0  ;;  %v570_v20 = vadd.f32 %v530_v12, %v529_v2  ;;  %v640_v37 = vrot.slane %v530_v12, 2 }
 0x191   : > { %v553_v21 = vadd.f32 %v552_v15, %v551_v8  ;;  %v667_v22 = vsel %vm609_vm4, %v666_v16, %v665_v58  ;;  %v563_v23 = vadd.f32 %v528_v17, %v527_v9  ;;  %v638_v24 = vrot.slane %v528_v17, 3  ;;  %v1226_v25 = vpop.f32.mrb[12].mxu0 }
 0x192   : > { %v561_v26 = vrot.slane %v560_v18, 1  ;;  %v571_v27 = vrot.slane %v570_v20, 4  ;;  %v513_v28 = vadd.f32 %v1226_v25, %v1886_v6  ;;  %v504_v29 = vpop.f32.mrb[13].mxu0  ;;  %v669_v30 = vsel %vm611_vm5, %v668_v19, %v667_v22 }
 0x193   : > { %v554_v31 = vrot.slane %v553_v21, 1  ;;  %v564_v32 = vrot.slane %v563_v23, 4  ;;  %v639_v33 = vsel %vm609_vm4, %v638_v24, %v637_v13  ;;  %v505_v34 = vadd.f32 %v504_v29, %v1886_v6  ;;  %v1227_v35 = vpop.f32.mrb[14].mxu0 }
 0x194   : > { %v572_v36 = vadd.f32 %v571_v27, %v570_v20  ;;  %v533_v38 = vmax.f32 %v513_v28, 0.0  ;;  %v516_v39 = vadd.f32 %v1227_v35, %v1886_v6  ;;  %v507_v41 = vpop.f32.mrb[15].mxu0  ;;  %v562_v46 = vadd.f32 %v561_v26, %v560_v18 }
 0x195   : > { %v555_v42 = vadd.f32 %v554_v31, %v553_v21  ;;  %v565_v43 = vadd.f32 %v564_v32, %v563_v23  ;;  %v531_v44 = vmax.f32 %v505_v34, 0.0  ;;  %v508_v45 = vadd.f32 %v507_v41, %v1886_v6 }
 0x196   : > { %v573_v47 = vrot.slane %v572_v36, 2  ;;  %v534_v48 = vmax.f32 %v516_v39, 0.0  ;;  %v641_v49 = vsel %vm611_vm5, %v640_v37, %v639_v33  ;;  %v672_v56 = vrot.slane %v533_v38, 1 }
 0x197   : > { %v606_v50 = vsel %vm605_vm1, %v555_v42, %v604_v14  ;;  %v566_v51 = vrot.slane %v565_v43, 2  ;;  %v670_v52 = vrot.slane %v531_v44, 2  ;;  %v532_v53 = vmax.f32 %v508_v45, 0.0 }
 0x198   : > { %v574_v54 = vadd.f32 %v573_v47, %v572_v36  ;;  %v608_v55 = vsel %vm607_vm2, %v562_v46, %v606_v50  ;;  %v584_v57 = vadd.f32 %v534_v48, %v533_v38  ;;  %v593_v16 = vsub.s32 1, %v1877_v3 }
 0x199   : > { %v567_v58 = vadd.f32 %v566_v51, %v565_v43  ;;  %v671_v59 = vsel %vm613_vm6, %v670_v52, %v669_v30  ;;  %v577_v60 = vadd.f32 %v532_v53, %v531_v44  ;;  %v642_v6 = vrot.slane %v532_v53, 1 }
 0x19a   : > { %v575_v40 = vrot.slane %v574_v54, 1  ;;  %v585_v61 = vrot.slane %v584_v57, 4  ;;  %v673_v62 = vsel %vm615_vm7, %v672_v56, %v671_v59  ;;  %v621_v17 = vsub.s32 2, %v1877_v3 }
 0x19b   : > { %v568_v63 = vrot.slane %v567_v58, 1  ;;  %v578_v0 = vrot.slane %v577_v60, 4  ;;  %v643_v2 = vsel %vm613_vm6, %v642_v6, %v641_v49  ;;  %v650_v20 = vsub.s32 3, %v1877_v3 }
 0x19c   : > { %v586_v4 = vadd.f32 %v585_v61, %v584_v57  ;;  %v644_v7 = vsel %vm615_vm7, %v534_v48, %v643_v2  ;;  %v576_v9 = vadd.f32 %v575_v40, %v574_v54  ;;  %v594_v22 = vrot.slane %v1883_v5, %v593_v16 }
 0x19d   : > { %v569_v1 = vadd.f32 %v568_v63, %v567_v58  ;;  %v579_v8 = vadd.f32 %v578_v0, %v577_v60  ;;  %v622_v23 = vrot.slane %v1883_v5, %v621_v17  ;;  %v651_v26 = vrot.slane %v1883_v5, %v650_v20 }
 0x19e   : > { %v587_v10 = vrot.slane %v586_v4, 2  ;;  %v993_v38 = vsub.s32 4, %v1877_v3 }
 0x19f   : > { %v610_v11 = vsel %vm609_vm4, %v569_v1, %v608_v55  ;;  %v580_v12 = vrot.slane %v579_v8, 2  ;;  %v646_v29 = vmul.f32 %v644_v7, %v622_v23  ;;  %v675_v30 = vmul.f32 %v673_v62, %v651_v26 }
 0x1a0   : > { %v588_v13 = vadd.f32 %v587_v10, %v586_v4  ;;  %v612_v14 = vsel %vm611_vm5, %v576_v9, %v610_v11  ;;  %v994_v39 = vrot.slane %v1883_v5, %v993_v38 }
 0x1a1   : > { %v581_v15 = vadd.f32 %v580_v12, %v579_v8 }
 0x1a2   : > { %v589_v18 = vrot.slane %v588_v13, 1 }
 0x1a3   : > { %v582_v19 = vrot.slane %v581_v15, 1 }
 0x1a4   : > { %v590_v24 = vadd.f32 %v589_v18, %v588_v13 }
 0x1a5   : > { %v583_v21 = vadd.f32 %v582_v19, %v581_v15 }
 0x1a7   : > { %v614_v25 = vsel %vm613_vm6, %v583_v21, %v612_v14 }
 0x1a8   : > { %v616_v27 = vsel %vm615_vm7, %v590_v24, %v614_v25 }
 0x1a9   : > { %v618_v28 = vmul.f32 %v616_v27, %v594_v22  ;;  %v897_v34 = vpop.f32.mrb[0].mxu1 }
 0x1aa   : > { %v1246_v35 = vpop.f32.mrb[1].mxu1 }
 0x1ab   : > { %v647_v31 = vsub.f32 %v618_v28, %v646_v29  ;;  %v900_v36 = vpop.f32.mrb[2].mxu1 }
 0x1ac   : > { %v1247_v37 = vpop.f32.mrb[3].mxu1 }
 0x1ad   : > { %v676_v32 = vsub.f32 %v647_v31, %v675_v30 }
 0x1af   : > { %v749_v33 = vpack.c.bf16 %v676_v32, %v676_v32 }
 0x1b1   : > { %1265 = vmatmul.mubr.bf16.vlgmr.msra.gmra.mrb[16].mxu0 %v749_v33 }
 0x284   : > { %v985_v41 = vpop.f32.mrb[16].mxu0 }
 0x285   : > { %v986_v42 = vadd.f32 %v985_v41, %v897_v34  ;;  %v1266_v43 = vpop.f32.mrb[17].mxu0 }
 0x286   : > { %v988_v44 = vpop.f32.mrb[18].mxu0 }
 0x287   : > { %v995_v45 = vadd.f32 %v994_v39, %v986_v42  ;;  %v1267_v46 = vpop.f32.mrb[19].mxu0 }
 0x289   : > { %996 = vst [vmem:[%s286_s13] sm:$0xff] %v995_v45 }
 0x28a   : > { %1516 = shalt.err (!%p1513_p4)
}
 0x28b   : > { %s1517_s29 = scalar_lea.hbm %s1938_s9, 128  ;;  %s1521_s24 = scalar_lea.hbm %s1987_s5, 256 }
 0x28c   : > { %p1518_p9 = scmp.ne.s32.totalorder %s1938_s9, %s1517_s29  ;;  %p1522_p8 = scmp.lt.u32.totalorder %s1938_s9, %s1987_s5 }
 0x28d   : > { %p1523_p13 = scmp.lt.u32.totalorder %s1521_s24, %s1517_s29  ;;  %p1525_p10 = scmp.lt.u32.totalorder %s1517_s29, %s1938_s9 }
 0x28e   : > { %p1519_p0 = pnand %p1518_p9, %p1772_p5 }
 0x28f   : > { %p1524_p6 = por %p1523_p13, %p1522_p8 }
 0x290   : > { %p1520_p11 = pneg %p1519_p0 }
 0x291   : > { %p1526_p3 = por %p1525_p10, %p1524_p6 }
 0x293   : > { %p1527_p7 = pnand %p1526_p3, %p1520_p11 }
 0x295   : > { %1530 = shalt.err (!%p1527_p7)
}
 0x296   : > { %1282 = dma.vmem_to_hbm [thread:$0]  (%p1772_p5), %s1940_s16, 128, %s1938_s9, %s998_s15  }
 0x297 PF: > { %s1023_s27 = sand.u32 1, %s1565_s18   ;;  %p2005_p12 = scmp.ne.s32.totalorder %s1992_s25, 0 }
 0x298   : > { %p2006_p1 = scmp.ge.s32.totalorder %s1577_s21, 2  ;;  %s1024_s13 = scalar_lea.sflag [#allocation4], %s1023_s27 }
 0x29a   : > { %p1299_p2 = pnand %p2006_p1, %p2005_p12 }
 0x29c   : > { %1560 = dma.done.wait (!%p1299_p2), %s1024_s13, 128  }
 0x29d   : > { %1562 = vsyncadd (!%p1299_p2), %s1024_s13, 4294967168  ;;  %p20_p4 = scmp.ge.s32.totalorder %s1758_s14, 4   ;;  %s2007_s18 = smov %s1569_s19 }
 0x29e   : > { %s2008_s19 = smov %s1573_s20  ;;  %s2009_s20 = smov %s1768_s30 }
 0x29f   : > { %s2010_s21 = smov %s1758_s14  ;;  %22 = sbr.rel (!%p20_p4) target bundleno = 7 (0x7), region = 97 }
 0x2a6   :  { %1029 = vsyncpa [#allocation3], 1 }
 0x2a7   :  { %1031 = vsyncpa [#allocation3 + $0x1], 1 }
 0x2a8   :  { %1032 = vsyncpa [#allocation6], 1 }
 0x2a9   :  { %1033 = vsyncpa [#allocation9], 1 }
 0x2aa   :  { %1034 = vsyncpa [#allocation4], 1 }
 0x2ab   :  { %1036 = vsyncpa [#allocation4 + $0x1], 1 }

</bundles_post_ra>
